<compile_context>
chip_gen: v7x
topology: tpu7x:2x2x1
jax: 0.10.0
libtpu: 0.0.40
codegen_flags: <defaults>
</compile_context>

<pallas_src>
import functools

import jax
import jax.numpy as jnp
from jax.experimental import pallas as pl
from jax.experimental.pallas import tpu as pltpu

# ---- "config" values (synthetic, small) -------------------------------------
NEUROTRANSMITTER_VECTOR_SIZE = 8    # LSTM input size D
ACTION_LSTM_HIDDEN_SIZE = 32        # LSTM hidden size H  (4H = 128 = one lane group)
ACTION_LSTM_OUTPUT_SIZE = 8         # Linear output size O

LANE = 128                          # vreg lane width (f32)
SUBLANE = 8                         # vreg sublane count (f32)


def _round_up(n, m):
    return ((n + m - 1) // m) * m


# ------------------------------- kernel --------------------------------------
def _lstm_kernel(x_ref, wih_ref, whh_ref, b_ref, wout_ref, bout_ref, out_ref,
                 *, seq_len, batch_p, hidden):
    """Whole LSTM recurrence + fused output linear in one grid step.

    x_ref:    (T*Bp, D)    time-major, row = t*Bp + b
    wih_ref:  (D, 4H)      natural PyTorch gate packing [i|f|g|o], 4H = 128 lanes
    whh_ref:  (H, 4H)      only the H live rows (no zero padding)
    b_ref:    (1, 4H)      b_ih + b_hh
    wout_ref: (H, Op)      rows = live hidden, cols zero-padded to 128 lanes
    bout_ref: (1, Op)
    out_ref:  (Bp, Op)     lane-dense output slab
    """
    T, Bp, H = seq_len, batch_p, hidden

    # Hoisted input projection: one tall (T*Bp, D)x(D, 4H) matmul for every
    # timestep, bias folded in exactly once.  (T*Bp, 128) f32 is only a handful
    # of vregs, so it stays register/VMEM-input resident (no scratch round-trip).
    gx = (jnp.dot(x_ref[...], wih_ref[...], preferred_element_type=jnp.float32)
          + b_ref[...])

    whh = whh_ref[...]              # (H, 4H), loop-invariant: load once

    def gate_acts(gates):
        # One EUP push for all three sigmoid gates (sigmoid(x) = 0.5*tanh(0.5x)+0.5,
        # exact identity; mul/add ride the VPU slot) + one EUP push for tanh,
        # both on the full (Bp, 128) vreg, then sliced per gate [i, f, g, o].
        s = 0.5 * jnp.tanh(0.5 * gates) + 0.5
        th = jnp.tanh(gates)
        i_g = s[:, 0 * H:1 * H]
        f_g = s[:, 1 * H:2 * H]
        g_g = th[:, 2 * H:3 * H]
        o_g = s[:, 3 * H:4 * H]
        return i_g, f_g, g_g, o_g

    # ---- t = 0 peeled: h = c = 0, so gates == gx[0] (no matmul, no f*c term).
    i_g, f_g, g_g, o_g = gate_acts(gx[0:Bp, :])
    c = i_g * g_g
    h = o_g * jnp.tanh(c)

    # ---- remaining steps: only h @ W_hh + elementwise gate math on the serial path.
    for t in range(1, T):
        gates = gx[t * Bp:(t + 1) * Bp, :] + jnp.dot(
            h, whh, preferred_element_type=jnp.float32)          # (Bp, 4H)
        i_g, f_g, g_g, o_g = gate_acts(gates)
        c = f_g * c + i_g * g_g
        h = o_g * jnp.tanh(c)

    # Fused output layer on the last hidden state, lane-dense store.
    out_ref[...] = (jnp.dot(h, wout_ref[...], preferred_element_type=jnp.float32)
                    + bout_ref[...])


# ------------------------------- wrapper --------------------------------------
@functools.partial(jax.jit, static_argnames=("out_size",))
def action_lstm_forward(x, padded_params, *, out_size=ACTION_LSTM_OUTPUT_SIZE):
    """x: (B, T, D) float32 (batch_first, like the PyTorch module).  Returns (B, O)."""
    B, T, D = x.shape
    H = padded_params["w_hh"].shape[0]        # live hidden size (32)
    Op = padded_params["w_out"].shape[1]      # padded output lanes (128)
    Bp = _round_up(max(B, 1), SUBLANE)

    # Time-major, batch padded to a full sublane group, flattened so the kernel
    # needs no in-kernel reshape (row t*Bp + b <-> (t, b)).  Fused into this jit.
    x_tm = jnp.transpose(x, (1, 0, 2))                        # (T, B, D)
    x_tm = jnp.pad(x_tm, ((0, 0), (0, Bp - B), (0, 0)))       # (T, Bp, D)
    x2d = x_tm.reshape(T * Bp, D)                             # (T*Bp, D)

    kernel = functools.partial(_lstm_kernel, seq_len=T, batch_p=Bp, hidden=H)

    out_p = pl.pallas_call(
        kernel,
        out_shape=jax.ShapeDtypeStruct((Bp, Op), jnp.float32),
        grid=(1,),                                            # single grid step
        in_specs=[
            pl.BlockSpec((T * Bp, D), lambda i: (0, 0)),      # x (whole sequence)
            pl.BlockSpec((D, 4 * H), lambda i: (0, 0)),       # W_ih  (D, 128)
            pl.BlockSpec((H, 4 * H), lambda i: (0, 0)),       # W_hh  (32, 128)
            pl.BlockSpec((1, 4 * H), lambda i: (0, 0)),       # bias  (ih + hh)
            pl.BlockSpec((H, Op), lambda i: (0, 0)),          # W_out (32, 128)
            pl.BlockSpec((1, Op), lambda i: (0, 0)),          # b_out
        ],
        out_specs=pl.BlockSpec((Bp, Op), lambda i: (0, 0)),
        compiler_params=pltpu.CompilerParams(
            dimension_semantics=("arbitrary",),
            vmem_limit_bytes=32 * 1024 * 1024,
        ),
    )(x2d, padded_params["w_ih"], padded_params["w_hh"], padded_params["bias"],
      padded_params["w_out"], padded_params["b_out"])

    return out_p[:B, :out_size]


# ------------------------------- params --------------------------------------
def init_params(key, D, H, O):
    """Deterministic synthetic parameters (PyTorch LSTM shapes, stored transposed)."""
    k = jax.random.split(key, 6)
    scale = 0.1
    # PyTorch: weight_ih (4H, D), weight_hh (4H, H), bias_ih/hh (4H,) — gate order [i,f,g,o].
    w_ih_pt = scale * jax.random.normal(k[0], (4 * H, D), jnp.float32)
    w_hh_pt = scale * jax.random.normal(k[1], (4 * H, H), jnp.float32)
    b_ih = scale * jax.random.normal(k[2], (4 * H,), jnp.float32)
    b_hh = scale * jax.random.normal(k[3], (4 * H,), jnp.float32)
    # PyTorch Linear: weight (O, H), bias (O,)
    w_out_pt = scale * jax.random.normal(k[4], (O, H), jnp.float32)
    b_out = scale * jax.random.normal(k[5], (O,), jnp.float32)
    return {
        "w_ih": w_ih_pt.T,                        # (D, 4H)
        "w_hh": w_hh_pt.T,                        # (H, 4H)
        "bias": (b_ih + b_hh).reshape(1, 4 * H),  # (1, 4H)
        "w_out": w_out_pt.T,                      # (H, O)
        "b_out": b_out.reshape(1, O),             # (1, O)
    }


def pad_params(params, H, O, Op):
    """Prepare kernel weights.

    Gates stay at their natural packing (4H = 128 lanes -> no gate padding, no
    zero rows in W_hh).  Only the output layer is lane-padded O -> Op so the
    kernel can do a lane-dense (Bp, 128) store; padded columns are exactly zero.
    """
    assert 4 * H == LANE, "kernel packing assumes 4*H == 128 lanes"
    w_out = jnp.pad(params["w_out"], ((0, 0), (0, Op - O)))   # (H, Op)
    b_out = jnp.pad(params["b_out"], ((0, 0), (0, Op - O)))   # (1, Op)
    return {
        "w_ih": params["w_ih"],        # (D, 4H)
        "w_hh": params["w_hh"],        # (H, 4H)
        "bias": params["bias"],        # (1, 4H)
        "w_out": w_out,
        "b_out": b_out,
    }


# ------------------------------ reference ------------------------------------
def reference_forward(x, params):
    """Pure-JAX reference (lax.scan over time), matches the PyTorch module."""
    B, T, D = x.shape
    H = params["w_hh"].shape[0]

    def step(carry, x_t):
        h, c = carry
        gates = x_t @ params["w_ih"] + h @ params["w_hh"] + params["bias"]
        i = jax.nn.sigmoid(gates[:, 0 * H:1 * H])
        f = jax.nn.sigmoid(gates[:, 1 * H:2 * H])
        g = jnp.tanh(gates[:, 2 * H:3 * H])
        o = jax.nn.sigmoid(gates[:, 3 * H:4 * H])
        c = f * c + i * g
        h = o * jnp.tanh(c)
        return (h, c), None

    h0 = jnp.zeros((B, H), jnp.float32)
    c0 = jnp.zeros((B, H), jnp.float32)
    (h_last, _), _ = jax.lax.scan(step, (h0, c0), jnp.transpose(x, (1, 0, 2)))
    return h_last @ params["w_out"] + params["b_out"]


if __name__ == "__main__":
    B, T = 2, 8
    D = NEUROTRANSMITTER_VECTOR_SIZE
    H = ACTION_LSTM_HIDDEN_SIZE
    O = ACTION_LSTM_OUTPUT_SIZE

    key = jax.random.PRNGKey(0)
    kx, kp = jax.random.split(key)
    x = jax.random.normal(kx, (B, T, D), jnp.float32)
    params = init_params(kp, D, H, O)
    padded_params = pad_params(params, H, O, LANE)

    out = action_lstm_forward(x, padded_params)
    out = jax.block_until_ready(out)

    ref = reference_forward(x, params)
    assert out.shape == (B, O), out.shape
    assert jnp.allclose(out, ref, atol=1e-5, rtol=1e-5), (out, ref)

    print("KERNEL_OK")
</pallas_src>

<mosaic_0001>
module attributes {stable_mosaic.version = 11 : i64} {
  func.func @_lstm_kernel(%arg0: i32, %arg1: memref<64x8xf32, #tpu.memory_space<vmem>>, %arg2: memref<8x128xf32, #tpu.memory_space<vmem>>, %arg3: memref<32x128xf32, #tpu.memory_space<vmem>>, %arg4: memref<1x128xf32, #tpu.memory_space<vmem>>, %arg5: memref<32x128xf32, #tpu.memory_space<vmem>>, %arg6: memref<1x128xf32, #tpu.memory_space<vmem>>, %arg7: memref<8x128xf32, #tpu.memory_space<vmem>>) attributes {dimension_semantics = [#tpu.dimension_semantics<arbitrary>], iteration_bounds = array<i64: 1>, scalar_prefetch = 0 : i64, scratch_operands = 0 : i64, tpu.core_type = #tpu.core_type<tc>, window_params = [{pipeline_mode = #tpu.pipeline_mode<synchronous>, transform_indices = @transform_0, window_bounds = array<i64: 64, 8>}, {pipeline_mode = #tpu.pipeline_mode<synchronous>, transform_indices = @transform_1, window_bounds = array<i64: 8, 128>}, {pipeline_mode = #tpu.pipeline_mode<synchronous>, transform_indices = @transform_2, window_bounds = array<i64: 32, 128>}, {pipeline_mode = #tpu.pipeline_mode<synchronous>, transform_indices = @transform_3, window_bounds = array<i64: 1, 128>}, {pipeline_mode = #tpu.pipeline_mode<synchronous>, transform_indices = @transform_4, window_bounds = array<i64: 32, 128>}, {pipeline_mode = #tpu.pipeline_mode<synchronous>, transform_indices = @transform_5, window_bounds = array<i64: 1, 128>}, {pipeline_mode = #tpu.pipeline_mode<synchronous>, transform_indices = @transform_6, window_bounds = array<i64: 8, 128>}]} {
    %c0 = arith.constant 0 : index
    %c0_0 = arith.constant 0 : index
    %0 = vector.load %arg1[%c0, %c0_0] : memref<64x8xf32, #tpu.memory_space<vmem>>, vector<64x8xf32>
    %c0_1 = arith.constant 0 : index
    %c0_2 = arith.constant 0 : index
    %1 = vector.load %arg2[%c0_1, %c0_2] : memref<8x128xf32, #tpu.memory_space<vmem>>, vector<8x128xf32>
    %cst = arith.constant dense<0.000000e+00> : vector<64x128xf32>
    %2 = tpu.matmul %0, %1, %cst {dimension_numbers = #tpu.dot_dimension_numbers<[1], [0], [0], [1], [0, 0, 1, 1], [], []>} : vector<64x8xf32>, vector<8x128xf32>, vector<64x128xf32> -> vector<64x128xf32>
    %c0_3 = arith.constant 0 : index
    %c0_4 = arith.constant 0 : index
    %3 = vector.load %arg4[%c0_3, %c0_4] : memref<1x128xf32, #tpu.memory_space<vmem>>, vector<1x128xf32>
    %4 = vector.broadcast %3 : vector<1x128xf32> to vector<64x128xf32>
    %5 = arith.addf %2, %4 : vector<64x128xf32>
    %c0_5 = arith.constant 0 : index
    %c0_6 = arith.constant 0 : index
    %6 = vector.load %arg3[%c0_5, %c0_6] : memref<32x128xf32, #tpu.memory_space<vmem>>, vector<32x128xf32>
    %7 = vector.extract_strided_slice %5 {offsets = [0, 0], sizes = [8, 128], strides = [1, 1]} : vector<64x128xf32> to vector<8x128xf32>
    %cst_7 = arith.constant 5.000000e-01 : f32
    %8 = vector.broadcast %cst_7 : f32 to vector<8x128xf32>
    %9 = arith.mulf %8, %7 : vector<8x128xf32>
    %10 = math.tanh %9 : vector<8x128xf32>
    %cst_8 = arith.constant 5.000000e-01 : f32
    %11 = vector.broadcast %cst_8 : f32 to vector<8x128xf32>
    %12 = arith.mulf %11, %10 : vector<8x128xf32>
    %cst_9 = arith.constant 5.000000e-01 : f32
    %13 = vector.broadcast %cst_9 : f32 to vector<8x128xf32>
    %14 = arith.addf %12, %13 : vector<8x128xf32>
    %15 = math.tanh %7 : vector<8x128xf32>
    %16 = vector.extract_strided_slice %14 {offsets = [0, 0], sizes = [8, 32], strides = [1, 1]} : vector<8x128xf32> to vector<8x32xf32>
    %17 = vector.extract_strided_slice %15 {offsets = [0, 64], sizes = [8, 32], strides = [1, 1]} : vector<8x128xf32> to vector<8x32xf32>
    %18 = vector.extract_strided_slice %14 {offsets = [0, 96], sizes = [8, 32], strides = [1, 1]} : vector<8x128xf32> to vector<8x32xf32>
    %19 = arith.mulf %16, %17 : vector<8x32xf32>
    %20 = math.tanh %19 : vector<8x32xf32>
    %21 = arith.mulf %18, %20 : vector<8x32xf32>
    %22 = vector.extract_strided_slice %5 {offsets = [8, 0], sizes = [8, 128], strides = [1, 1]} : vector<64x128xf32> to vector<8x128xf32>
    %cst_10 = arith.constant dense<0.000000e+00> : vector<8x128xf32>
    %23 = tpu.matmul %21, %6, %cst_10 {dimension_numbers = #tpu.dot_dimension_numbers<[1], [0], [0], [1], [0, 0, 1, 1], [], []>} : vector<8x32xf32>, vector<32x128xf32>, vector<8x128xf32> -> vector<8x128xf32>
    %24 = arith.addf %22, %23 : vector<8x128xf32>
    %cst_11 = arith.constant 5.000000e-01 : f32
    %25 = vector.broadcast %cst_11 : f32 to vector<8x128xf32>
    %26 = arith.mulf %25, %24 : vector<8x128xf32>
    %27 = math.tanh %26 : vector<8x128xf32>
    %cst_12 = arith.constant 5.000000e-01 : f32
    %28 = vector.broadcast %cst_12 : f32 to vector<8x128xf32>
    %29 = arith.mulf %28, %27 : vector<8x128xf32>
    %cst_13 = arith.constant 5.000000e-01 : f32
    %30 = vector.broadcast %cst_13 : f32 to vector<8x128xf32>
    %31 = arith.addf %29, %30 : vector<8x128xf32>
    %32 = math.tanh %24 : vector<8x128xf32>
    %33 = vector.extract_strided_slice %31 {offsets = [0, 0], sizes = [8, 32], strides = [1, 1]} : vector<8x128xf32> to vector<8x32xf32>
    %34 = vector.extract_strided_slice %31 {offsets = [0, 32], sizes = [8, 32], strides = [1, 1]} : vector<8x128xf32> to vector<8x32xf32>
    %35 = vector.extract_strided_slice %32 {offsets = [0, 64], sizes = [8, 32], strides = [1, 1]} : vector<8x128xf32> to vector<8x32xf32>
    %36 = vector.extract_strided_slice %31 {offsets = [0, 96], sizes = [8, 32], strides = [1, 1]} : vector<8x128xf32> to vector<8x32xf32>
    %37 = arith.mulf %34, %19 : vector<8x32xf32>
    %38 = arith.mulf %33, %35 : vector<8x32xf32>
    %39 = arith.addf %37, %38 : vector<8x32xf32>
    %40 = math.tanh %39 : vector<8x32xf32>
    %41 = arith.mulf %36, %40 : vector<8x32xf32>
    %42 = vector.extract_strided_slice %5 {offsets = [16, 0], sizes = [8, 128], strides = [1, 1]} : vector<64x128xf32> to vector<8x128xf32>
    %cst_14 = arith.constant dense<0.000000e+00> : vector<8x128xf32>
    %43 = tpu.matmul %41, %6, %cst_14 {dimension_numbers = #tpu.dot_dimension_numbers<[1], [0], [0], [1], [0, 0, 1, 1], [], []>} : vector<8x32xf32>, vector<32x128xf32>, vector<8x128xf32> -> vector<8x128xf32>
    %44 = arith.addf %42, %43 : vector<8x128xf32>
    %cst_15 = arith.constant 5.000000e-01 : f32
    %45 = vector.broadcast %cst_15 : f32 to vector<8x128xf32>
    %46 = arith.mulf %45, %44 : vector<8x128xf32>
    %47 = math.tanh %46 : vector<8x128xf32>
    %cst_16 = arith.constant 5.000000e-01 : f32
    %48 = vector.broadcast %cst_16 : f32 to vector<8x128xf32>
    %49 = arith.mulf %48, %47 : vector<8x128xf32>
    %cst_17 = arith.constant 5.000000e-01 : f32
    %50 = vector.broadcast %cst_17 : f32 to vector<8x128xf32>
    %51 = arith.addf %49, %50 : vector<8x128xf32>
    %52 = math.tanh %44 : vector<8x128xf32>
    %53 = vector.extract_strided_slice %51 {offsets = [0, 0], sizes = [8, 32], strides = [1, 1]} : vector<8x128xf32> to vector<8x32xf32>
    %54 = vector.extract_strided_slice %51 {offsets = [0, 32], sizes = [8, 32], strides = [1, 1]} : vector<8x128xf32> to vector<8x32xf32>
    %55 = vector.extract_strided_slice %52 {offsets = [0, 64], sizes = [8, 32], strides = [1, 1]} : vector<8x128xf32> to vector<8x32xf32>
    %56 = vector.extract_strided_slice %51 {offsets = [0, 96], sizes = [8, 32], strides = [1, 1]} : vector<8x128xf32> to vector<8x32xf32>
    %57 = arith.mulf %54, %39 : vector<8x32xf32>
    %58 = arith.mulf %53, %55 : vector<8x32xf32>
    %59 = arith.addf %57, %58 : vector<8x32xf32>
    %60 = math.tanh %59 : vector<8x32xf32>
    %61 = arith.mulf %56, %60 : vector<8x32xf32>
    %62 = vector.extract_strided_slice %5 {offsets = [24, 0], sizes = [8, 128], strides = [1, 1]} : vector<64x128xf32> to vector<8x128xf32>
    %cst_18 = arith.constant dense<0.000000e+00> : vector<8x128xf32>
    %63 = tpu.matmul %61, %6, %cst_18 {dimension_numbers = #tpu.dot_dimension_numbers<[1], [0], [0], [1], [0, 0, 1, 1], [], []>} : vector<8x32xf32>, vector<32x128xf32>, vector<8x128xf32> -> vector<8x128xf32>
    %64 = arith.addf %62, %63 : vector<8x128xf32>
    %cst_19 = arith.constant 5.000000e-01 : f32
    %65 = vector.broadcast %cst_19 : f32 to vector<8x128xf32>
    %66 = arith.mulf %65, %64 : vector<8x128xf32>
    %67 = math.tanh %66 : vector<8x128xf32>
    %cst_20 = arith.constant 5.000000e-01 : f32
    %68 = vector.broadcast %cst_20 : f32 to vector<8x128xf32>
    %69 = arith.mulf %68, %67 : vector<8x128xf32>
    %cst_21 = arith.constant 5.000000e-01 : f32
    %70 = vector.broadcast %cst_21 : f32 to vector<8x128xf32>
    %71 = arith.addf %69, %70 : vector<8x128xf32>
    %72 = math.tanh %64 : vector<8x128xf32>
    %73 = vector.extract_strided_slice %71 {offsets = [0, 0], sizes = [8, 32], strides = [1, 1]} : vector<8x128xf32> to vector<8x32xf32>
    %74 = vector.extract_strided_slice %71 {offsets = [0, 32], sizes = [8, 32], strides = [1, 1]} : vector<8x128xf32> to vector<8x32xf32>
    %75 = vector.extract_strided_slice %72 {offsets = [0, 64], sizes = [8, 32], strides = [1, 1]} : vector<8x128xf32> to vector<8x32xf32>
    %76 = vector.extract_strided_slice %71 {offsets = [0, 96], sizes = [8, 32], strides = [1, 1]} : vector<8x128xf32> to vector<8x32xf32>
    %77 = arith.mulf %74, %59 : vector<8x32xf32>
    %78 = arith.mulf %73, %75 : vector<8x32xf32>
    %79 = arith.addf %77, %78 : vector<8x32xf32>
    %80 = math.tanh %79 : vector<8x32xf32>
    %81 = arith.mulf %76, %80 : vector<8x32xf32>
    %82 = vector.extract_strided_slice %5 {offsets = [32, 0], sizes = [8, 128], strides = [1, 1]} : vector<64x128xf32> to vector<8x128xf32>
    %cst_22 = arith.constant dense<0.000000e+00> : vector<8x128xf32>
    %83 = tpu.matmul %81, %6, %cst_22 {dimension_numbers = #tpu.dot_dimension_numbers<[1], [0], [0], [1], [0, 0, 1, 1], [], []>} : vector<8x32xf32>, vector<32x128xf32>, vector<8x128xf32> -> vector<8x128xf32>
    %84 = arith.addf %82, %83 : vector<8x128xf32>
    %cst_23 = arith.constant 5.000000e-01 : f32
    %85 = vector.broadcast %cst_23 : f32 to vector<8x128xf32>
    %86 = arith.mulf %85, %84 : vector<8x128xf32>
    %87 = math.tanh %86 : vector<8x128xf32>
    %cst_24 = arith.constant 5.000000e-01 : f32
    %88 = vector.broadcast %cst_24 : f32 to vector<8x128xf32>
    %89 = arith.mulf %88, %87 : vector<8x128xf32>
    %cst_25 = arith.constant 5.000000e-01 : f32
    %90 = vector.broadcast %cst_25 : f32 to vector<8x128xf32>
    %91 = arith.addf %89, %90 : vector<8x128xf32>
    %92 = math.tanh %84 : vector<8x128xf32>
    %93 = vector.extract_strided_slice %91 {offsets = [0, 0], sizes = [8, 32], strides = [1, 1]} : vector<8x128xf32> to vector<8x32xf32>
    %94 = vector.extract_strided_slice %91 {offsets = [0, 32], sizes = [8, 32], strides = [1, 1]} : vector<8x128xf32> to vector<8x32xf32>
    %95 = vector.extract_strided_slice %92 {offsets = [0, 64], sizes = [8, 32], strides = [1, 1]} : vector<8x128xf32> to vector<8x32xf32>
    %96 = vector.extract_strided_slice %91 {offsets = [0, 96], sizes = [8, 32], strides = [1, 1]} : vector<8x128xf32> to vector<8x32xf32>
    %97 = arith.mulf %94, %79 : vector<8x32xf32>
    %98 = arith.mulf %93, %95 : vector<8x32xf32>
    %99 = arith.addf %97, %98 : vector<8x32xf32>
    %100 = math.tanh %99 : vector<8x32xf32>
    %101 = arith.mulf %96, %100 : vector<8x32xf32>
    %102 = vector.extract_strided_slice %5 {offsets = [40, 0], sizes = [8, 128], strides = [1, 1]} : vector<64x128xf32> to vector<8x128xf32>
    %cst_26 = arith.constant dense<0.000000e+00> : vector<8x128xf32>
    %103 = tpu.matmul %101, %6, %cst_26 {dimension_numbers = #tpu.dot_dimension_numbers<[1], [0], [0], [1], [0, 0, 1, 1], [], []>} : vector<8x32xf32>, vector<32x128xf32>, vector<8x128xf32> -> vector<8x128xf32>
    %104 = arith.addf %102, %103 : vector<8x128xf32>
    %cst_27 = arith.constant 5.000000e-01 : f32
    %105 = vector.broadcast %cst_27 : f32 to vector<8x128xf32>
    %106 = arith.mulf %105, %104 : vector<8x128xf32>
    %107 = math.tanh %106 : vector<8x128xf32>
    %cst_28 = arith.constant 5.000000e-01 : f32
    %108 = vector.broadcast %cst_28 : f32 to vector<8x128xf32>
    %109 = arith.mulf %108, %107 : vector<8x128xf32>
    %cst_29 = arith.constant 5.000000e-01 : f32
    %110 = vector.broadcast %cst_29 : f32 to vector<8x128xf32>
    %111 = arith.addf %109, %110 : vector<8x128xf32>
    %112 = math.tanh %104 : vector<8x128xf32>
    %113 = vector.extract_strided_slice %111 {offsets = [0, 0], sizes = [8, 32], strides = [1, 1]} : vector<8x128xf32> to vector<8x32xf32>
    %114 = vector.extract_strided_slice %111 {offsets = [0, 32], sizes = [8, 32], strides = [1, 1]} : vector<8x128xf32> to vector<8x32xf32>
    %115 = vector.extract_strided_slice %112 {offsets = [0, 64], sizes = [8, 32], strides = [1, 1]} : vector<8x128xf32> to vector<8x32xf32>
    %116 = vector.extract_strided_slice %111 {offsets = [0, 96], sizes = [8, 32], strides = [1, 1]} : vector<8x128xf32> to vector<8x32xf32>
    %117 = arith.mulf %114, %99 : vector<8x32xf32>
    %118 = arith.mulf %113, %115 : vector<8x32xf32>
    %119 = arith.addf %117, %118 : vector<8x32xf32>
    %120 = math.tanh %119 : vector<8x32xf32>
    %121 = arith.mulf %116, %120 : vector<8x32xf32>
    %122 = vector.extract_strided_slice %5 {offsets = [48, 0], sizes = [8, 128], strides = [1, 1]} : vector<64x128xf32> to vector<8x128xf32>
    %cst_30 = arith.constant dense<0.000000e+00> : vector<8x128xf32>
    %123 = tpu.matmul %121, %6, %cst_30 {dimension_numbers = #tpu.dot_dimension_numbers<[1], [0], [0], [1], [0, 0, 1, 1], [], []>} : vector<8x32xf32>, vector<32x128xf32>, vector<8x128xf32> -> vector<8x128xf32>
    %124 = arith.addf %122, %123 : vector<8x128xf32>
    %cst_31 = arith.constant 5.000000e-01 : f32
    %125 = vector.broadcast %cst_31 : f32 to vector<8x128xf32>
    %126 = arith.mulf %125, %124 : vector<8x128xf32>
    %127 = math.tanh %126 : vector<8x128xf32>
    %cst_32 = arith.constant 5.000000e-01 : f32
    %128 = vector.broadcast %cst_32 : f32 to vector<8x128xf32>
    %129 = arith.mulf %128, %127 : vector<8x128xf32>
    %cst_33 = arith.constant 5.000000e-01 : f32
    %130 = vector.broadcast %cst_33 : f32 to vector<8x128xf32>
    %131 = arith.addf %129, %130 : vector<8x128xf32>
    %132 = math.tanh %124 : vector<8x128xf32>
    %133 = vector.extract_strided_slice %131 {offsets = [0, 0], sizes = [8, 32], strides = [1, 1]} : vector<8x128xf32> to vector<8x32xf32>
    %134 = vector.extract_strided_slice %131 {offsets = [0, 32], sizes = [8, 32], strides = [1, 1]} : vector<8x128xf32> to vector<8x32xf32>
    %135 = vector.extract_strided_slice %132 {offsets = [0, 64], sizes = [8, 32], strides = [1, 1]} : vector<8x128xf32> to vector<8x32xf32>
    %136 = vector.extract_strided_slice %131 {offsets = [0, 96], sizes = [8, 32], strides = [1, 1]} : vector<8x128xf32> to vector<8x32xf32>
    %137 = arith.mulf %134, %119 : vector<8x32xf32>
    %138 = arith.mulf %133, %135 : vector<8x32xf32>
    %139 = arith.addf %137, %138 : vector<8x32xf32>
    %140 = math.tanh %139 : vector<8x32xf32>
    %141 = arith.mulf %136, %140 : vector<8x32xf32>
    %142 = vector.extract_strided_slice %5 {offsets = [56, 0], sizes = [8, 128], strides = [1, 1]} : vector<64x128xf32> to vector<8x128xf32>
    %cst_34 = arith.constant dense<0.000000e+00> : vector<8x128xf32>
    %143 = tpu.matmul %141, %6, %cst_34 {dimension_numbers = #tpu.dot_dimension_numbers<[1], [0], [0], [1], [0, 0, 1, 1], [], []>} : vector<8x32xf32>, vector<32x128xf32>, vector<8x128xf32> -> vector<8x128xf32>
    %144 = arith.addf %142, %143 : vector<8x128xf32>
    %cst_35 = arith.constant 5.000000e-01 : f32
    %145 = vector.broadcast %cst_35 : f32 to vector<8x128xf32>
    %146 = arith.mulf %145, %144 : vector<8x128xf32>
    %147 = math.tanh %146 : vector<8x128xf32>
    %cst_36 = arith.constant 5.000000e-01 : f32
    %148 = vector.broadcast %cst_36 : f32 to vector<8x128xf32>
    %149 = arith.mulf %148, %147 : vector<8x128xf32>
    %cst_37 = arith.constant 5.000000e-01 : f32
    %150 = vector.broadcast %cst_37 : f32 to vector<8x128xf32>
    %151 = arith.addf %149, %150 : vector<8x128xf32>
    %152 = math.tanh %144 : vector<8x128xf32>
    %153 = vector.extract_strided_slice %151 {offsets = [0, 0], sizes = [8, 32], strides = [1, 1]} : vector<8x128xf32> to vector<8x32xf32>
    %154 = vector.extract_strided_slice %151 {offsets = [0, 32], sizes = [8, 32], strides = [1, 1]} : vector<8x128xf32> to vector<8x32xf32>
    %155 = vector.extract_strided_slice %152 {offsets = [0, 64], sizes = [8, 32], strides = [1, 1]} : vector<8x128xf32> to vector<8x32xf32>
    %156 = vector.extract_strided_slice %151 {offsets = [0, 96], sizes = [8, 32], strides = [1, 1]} : vector<8x128xf32> to vector<8x32xf32>
    %157 = arith.mulf %154, %139 : vector<8x32xf32>
    %158 = arith.mulf %153, %155 : vector<8x32xf32>
    %159 = arith.addf %157, %158 : vector<8x32xf32>
    %160 = math.tanh %159 : vector<8x32xf32>
    %161 = arith.mulf %156, %160 : vector<8x32xf32>
    %c0_38 = arith.constant 0 : index
    %c0_39 = arith.constant 0 : index
    %162 = vector.load %arg5[%c0_38, %c0_39] : memref<32x128xf32, #tpu.memory_space<vmem>>, vector<32x128xf32>
    %cst_40 = arith.constant dense<0.000000e+00> : vector<8x128xf32>
    %163 = tpu.matmul %161, %162, %cst_40 {dimension_numbers = #tpu.dot_dimension_numbers<[1], [0], [0], [1], [0, 0, 1, 1], [], []>} : vector<8x32xf32>, vector<32x128xf32>, vector<8x128xf32> -> vector<8x128xf32>
    %c0_41 = arith.constant 0 : index
    %c0_42 = arith.constant 0 : index
    %164 = vector.load %arg6[%c0_41, %c0_42] : memref<1x128xf32, #tpu.memory_space<vmem>>, vector<1x128xf32>
    %165 = vector.broadcast %164 : vector<1x128xf32> to vector<8x128xf32>
    %166 = arith.addf %163, %165 : vector<8x128xf32>
    %c0_43 = arith.constant 0 : index
    %c0_44 = arith.constant 0 : index
    %167 = vector.load %arg7[%c0_43, %c0_44] : memref<8x128xf32, #tpu.memory_space<vmem>>, vector<8x128xf32>
    tpu.vector_store %arg7[%c0_43, %c0_44], %166 {strides = array<i32>} : memref<8x128xf32, #tpu.memory_space<vmem>>, vector<8x128xf32>,
    return
  }
  func.func @transform_0(%arg0: i32) -> (i32, i32) {
    %c0_i32 = arith.constant 0 : i32
    %c0_i32_0 = arith.constant 0 : i32
    %c0_i32_1 = arith.constant 0 : i32
    return %c0_i32, %c0_i32_0 : i32, i32
  }
  func.func @transform_1(%arg0: i32) -> (i32, i32) {
    %c0_i32 = arith.constant 0 : i32
    %c0_i32_0 = arith.constant 0 : i32
    %c0_i32_1 = arith.constant 0 : i32
    return %c0_i32, %c0_i32_0 : i32, i32
  }
  func.func @transform_2(%arg0: i32) -> (i32, i32) {
    %c0_i32 = arith.constant 0 : i32
    %c0_i32_0 = arith.constant 0 : i32
    %c0_i32_1 = arith.constant 0 : i32
    return %c0_i32, %c0_i32_0 : i32, i32
  }
  func.func @transform_3(%arg0: i32) -> (i32, i32) {
    %c0_i32 = arith.constant 0 : i32
    %c0_i32_0 = arith.constant 0 : i32
    %c0_i32_1 = arith.constant 0 : i32
    return %c0_i32, %c0_i32_0 : i32, i32
  }
  func.func @transform_4(%arg0: i32) -> (i32, i32) {
    %c0_i32 = arith.constant 0 : i32
    %c0_i32_0 = arith.constant 0 : i32
    %c0_i32_1 = arith.constant 0 : i32
    return %c0_i32, %c0_i32_0 : i32, i32
  }
  func.func @transform_5(%arg0: i32) -> (i32, i32) {
    %c0_i32 = arith.constant 0 : i32
    %c0_i32_0 = arith.constant 0 : i32
    %c0_i32_1 = arith.constant 0 : i32
    return %c0_i32, %c0_i32_0 : i32, i32
  }
  func.func @transform_6(%arg0: i32) -> (i32, i32) {
    %c0_i32 = arith.constant 0 : i32
    %c0_i32_0 = arith.constant 0 : i32
    %c0_i32_1 = arith.constant 0 : i32
    return %c0_i32, %c0_i32_0 : i32, i32
  }
}

</mosaic_0001>

<bundles_post_ra>
// kernel: action_lstm_forward.1
= control target key start
LH: loop header
LB: loop body
LE: loop exit
PB: predicated region body
PF: predicated region fallthrough
CT: control target
= control target key end

     0   :  { %vm39_vm0 = vcmask 64512   ;;  %v1243_v14 = vmov 0.0|0.0   ;;  %vm1244_vm1 = vmmov 0   ;;  %v1245_v18 = vmov 0.0   ;;  %s1247_s12 = smov 32   ;;  %s1459_s1 = inlined_call_operand.vmem [shape: f32[8,128], index: 1, kind: input, shape index: {}]   ;;  %s1460_s0 = inlined_call_operand.vmem [shape: f32[64,8], index: 0, kind: input, shape index: {}]   ;;  %s1461_s3 = inlined_call_operand.vmem [shape: f32[1,128], index: 3, kind: input, shape index: {}]   ;;  %s1462_s2 = inlined_call_operand.vmem [shape: f32[32,128], index: 2, kind: input, shape index: {}]   ;;  %s1463_s4 = inlined_call_operand.vmem [shape: f32[32,128], index: 4, kind: input, shape index: {}]   ;;  %s1464_s5 = inlined_call_operand.vmem [shape: f32[1,128], index: 5, kind: input, shape index: {}]   ;;  %s1465_s6 = inlined_call_operand.vmem [shape: f32[8,128], index: 6, kind: output, shape index: {}]  }
   0x1   :  { %v31_v0 = vld [vmem:[%s1459_s1] sm:$0xff]  ;;  %v24_v2 = vld [vmem:[%s1460_s0 + $0x8] sm:$0xff]  ;;  %s1242_s1 = smov 64   ;;  %1140 = vmatprep.subr.bf16.mxu1 %v1243_v14  ;;  %v171_v17 = vld [vmem:[%s1462_s2 + $0x10] sm:$0xff]  ;;  %1060 = vmatprep.mubr.msk.f32.mxu1 %vm1244_vm1, %v1245_v18  ;;  %vm192_vm2 = vcmask 261120  }
   0x2   :  { %v23_v1 = vld [vmem:[%s1460_s0] sm:$0xff]  ;;  %1038 = vmatprep.subr.mxu0 %v31_v0  ;;  %v170_v16 = vld [vmem:[%s1462_s2 + $0x8] sm:$0xff]  ;;  %v172_v20 = vld [vmem:[%s1462_s2 + $0x18] sm:$0xff] }
   0x3   :  { %1040 = vmatprep.mubr.msk.f32.mxu0 %vm39_vm0, %v23_v1  ;;  %1039 = vmatpush3.msra.mxu0 %v31_v0  ;;  %v1297_v3 = vld [vmem:[%s1461_s3] ss:$0 sm:$0xff]  ;;  %v1320_v21 = vpack.c.bf16 %v172_v20, %v171_v17  ;;  %v25_v41 = vld [vmem:[%s1460_s0 + $0x10] sm:$0xff]  ;;  %v26_v42 = vld [vmem:[%s1460_s0 + $0x18] sm:$0xff] }
   0x4   :  { %1041 = vmatmul.mubr.msk.f32.vlgmr.msra.gmra.mrb[0].mxu0 %vm39_vm0, %v24_v2  ;;  %v169_v15 = vld [vmem:[%s1462_s2] sm:$0xff]  ;;  %1152 = vmatprep.subr.bf16.mxu0 %v1243_v14  ;;  %s1246_s2 = smov 96   ;;  %v28_v0 = vld [vmem:[%s1460_s0 + $0x28] sm:$0xff]  ;;  %v29_v1 = vld [vmem:[%s1460_s0 + $0x30] sm:$0xff] }
   0x5   :  { %v1313_v19 = vpack.c.bf16 %v170_v16, %v169_v15  ;;  %1043 = vmatprep.mubr.msk.f32.mxu0 %vm39_vm0, %v25_v41  ;;  %v27_v63 = vld [vmem:[%s1460_s0 + $0x20] sm:$0xff]  ;;  %v30_v2 = vld [vmem:[%s1460_s0 + $0x38] sm:$0xff] }
   0x7   :  { %1142 = vmatpush3.bf16.msra.mxu1 %v1313_v19  ;;  %1154 = vmatpush3.bf16.msra.mxu0 %v1313_v19 }
   0x8   :  { %1143 = vmatprep.subr.bf16.mxu1 %v1243_v14  ;;  %1155 = vmatprep.subr.bf16.mxu0 %v1243_v14 }
   0x9   :  { %1044 = vmatmul.mubr.msk.f32.gmra.mrb[2].mxu0 %vm39_vm0, %v26_v42 }
   0xa   :  { %1046 = vmatprep.mubr.msk.f32.mxu0 %vm39_vm0, %v27_v63 }
   0xb   :  { %1145 = vmatpush3.bf16.msra.mxu1 %v1320_v21  ;;  %1157 = vmatpush3.bf16.msra.mxu0 %v1320_v21 }
   0xc   :  { %1146 = vmatprep.subr.bf16.mxu1 %v1243_v14  ;;  %1164 = vmatprep.subr.bf16.mxu0 %v1243_v14 }
   0xd   :  { %1047 = vmatmul.mubr.msk.f32.gmra.mrb[4].mxu0 %vm39_vm0, %v28_v0 }
   0xe   :  { %1049 = vmatprep.mubr.msk.f32.mxu0 %vm39_vm0, %v29_v1 }
  0x11   :  { %1050 = vmatmul.mubr.msk.f32.gmra.mrb[6].mxu0 %vm39_vm0, %v30_v2 }
  0x12   :  { %1082 = vmatprep.mubr.msk.f32.mxu0 %vm1244_vm1, %v1245_v18 }
  0xd7   :  { %v1042_v4 = vpop.f32.mrb[0].mxu0 }
  0xd8   :  { %v130_v5 = vpop.f32.mrb[1].mxu0  ;;  %v136_v26 = vadd.f32 %v1042_v4, %v1297_v3 }
  0xd9   :  { %v131_v6 = vadd.f32 %v1297_v3, %v130_v5 }
  0xdb   :  { %1194 = vtanh.f32 %v131_v6  ;;  %v173_v8 = vmul.f32 0.5, %v131_v6 }
  0xdc   :  { %v1045_v46 = vpop.f32.mrb[2].mxu0 }
  0xdd   :  { %1196 = vtanh.f32 %v173_v8  ;;  %v140_v47 = vpop.f32.mrb[3].mxu0 }
  0xde   :  { %v141_v49 = vadd.f32 %v1297_v3, %v140_v47 }
  0xe5   :  { %v1195_v7 = vpop.eup %1194 }
  0xe6   :  { %179 = vrot.lane.b32.xlu0 %v1195_v7, %s1242_s1  ;;  %v1381_v7 = vpop.f32.mrb[4].mxu0 }
  0xe7   :  { %v1197_v9 = vpop.eup %1196  ;;  %v150_v8 = vpop.f32.mrb[5].mxu0 }
  0xe8   :  { %v175_v10 = vmul.f32 0.5, %v1197_v9  ;;  %v1383_v9 = vpop.f32.mrb[6].mxu0 }
  0xea   :  { %v176_v11 = vadd.f32 0.5, %v175_v10  ;;  %v1385_v10 = vpop.f32.mrb[7].mxu0 }
 0x158   :  { %v180_v12 = vpop.permute.xlu0 %179 }
 0x159   :  { %v182_v13 = vmul.f32 %v180_v12, %v176_v11  ;;  %v146_v12 = vadd.f32 %v1045_v46, %v1297_v3 }
 0x15b   :  { %1198 = vtanh.f32 %v182_v13 }
 0x165   :  { %v1199_v22 = vpop.eup %1198 }
 0x166   :  { %185 = vrot.lane.b32.xlu0 %v1199_v22, %s1246_s2 }
 0x16a   :  { %272 = vrot.lane.b32.xlu0 %v182_v13, %s1247_s12 }
 0x1d8   :  { %v186_v23 = vpop.permute.xlu0 %185 }
 0x1d9   :  { %v188_v24 = vmul.f32 %v186_v23, %v176_v11 }
 0x1db   :  { %190 = vrot.lane.b32.xlu1 %v188_v24, %s1247_s12 }
 0x1dc   :  { %v273_v37 = vpop.permute.xlu0 %272 }
 0x24d   :  { %v191_v25 = vpop.permute.xlu1 %190 }
 0x24e   :  { %1061 = vmatmul.mubr.msk.f32.vlgmr.msra.gmra.mrb[0].mxu1 %vm192_vm2, %v191_v25 }
 0x24f   :  { %1148 = vmatpush3.bf16.msra.mxu1 %v1313_v19  ;;  %1071 = vmatprep.mubr.msk.f32.mxu1 %vm1244_vm1, %v1245_v18 }
 0x250   :  { %1149 = vmatprep.subr.bf16.mxu1 %v1243_v14 }
 0x253   :  { %1151 = vmatpush3.bf16.msra.mxu1 %v1320_v21 }
 0x254   :  { %1158 = vmatprep.subr.bf16.mxu1 %v1243_v14 }
 0x321   :  { %v261_v27 = vpop.f32.mrb[0].mxu1 }
 0x322   :  { %v265_v28 = vadd.f32 %v261_v27, %v136_v26  ;;  %v1062_v29 = vpop.f32.mrb[1].mxu1 }
 0x324   :  { %1200 = vtanh.f32 %v265_v28  ;;  %v266_v31 = vmul.f32 0.5, %v265_v28 }
 0x326   :  { %1202 = vtanh.f32 %v266_v31 }
 0x32e   :  { %v1201_v30 = vpop.eup %1200 }
 0x32f   :  { %277 = vrot.lane.b32.xlu1 %v1201_v30, %s1242_s1 }
 0x330   :  { %v1203_v32 = vpop.eup %1202 }
 0x331   :  { %v268_v33 = vmul.f32 0.5, %v1203_v32 }
 0x333   :  { %v269_v34 = vadd.f32 0.5, %v268_v33 }
 0x335   :  { %v275_v38 = vmul.f32 %v273_v37, %v269_v34 }
 0x3a1   :  { %v278_v35 = vpop.permute.xlu1 %277 }
 0x3a2   :  { %v280_v36 = vmul.f32 %v278_v35, %v269_v34 }
 0x3a4   :  { %282 = vrot.lane.b32.xlu1 %v280_v36, %s1247_s12 }
 0x416   :  { %v283_v39 = vpop.permute.xlu1 %282 }
 0x417   :  { %v285_v40 = vadd.f32 %v283_v39, %v275_v38 }
 0x419   :  { %1204 = vtanh.f32 %v285_v40 }
 0x423   :  { %v1205_v43 = vpop.eup %1204 }
 0x424   :  { %288 = vrot.lane.b32.xlu0 %v1205_v43, %s1242_s1 }
 0x496   :  { %v289_v44 = vpop.permute.xlu0 %288 }
 0x497   :  { %v291_v45 = vmul.f32 %v289_v44, %v269_v34  ;;  %v151_v34 = vadd.f32 %v1297_v3, %v150_v8 }
 0x499   :  { %293 = vrot.lane.b32.xlu1 %v291_v45, %s1247_s12 }
 0x50b   :  { %v294_v48 = vpop.permute.xlu1 %293 }
 0x50c   :  { %1072 = vmatmul.mubr.msk.f32.vlgmr.msra.gmra.mrb[2].mxu1 %vm192_vm2, %v294_v48 }
 0x50d   :  { %1160 = vmatpush3.bf16.msra.mxu1 %v1313_v19  ;;  %1093 = vmatprep.mubr.msk.f32.mxu1 %vm1244_vm1, %v1245_v18 }
 0x50e   :  { %1161 = vmatprep.subr.bf16.mxu1 %v1243_v14 }
 0x511   :  { %1163 = vmatpush3.bf16.msra.mxu1 %v1320_v21 }
 0x512   :  { %1170 = vmatprep.subr.bf16.mxu1 %v1243_v14 }
 0x5df   :  { %v363_v50 = vpop.f32.mrb[2].mxu1 }
 0x5e0   :  { %v367_v51 = vadd.f32 %v363_v50, %v141_v49  ;;  %v1073_v52 = vpop.f32.mrb[3].mxu1 }
 0x5e1   :  { %v156_v52 = vadd.f32 %v1381_v7, %v1297_v3 }
 0x5e2   :  { %1206 = vtanh.f32 %v367_v51  ;;  %v368_v54 = vmul.f32 0.5, %v367_v51 }
 0x5e4   :  { %1208 = vtanh.f32 %v368_v54 }
 0x5ec   :  { %v1207_v53 = vpop.eup %1206 }
 0x5ed   :  { %375 = vrot.lane.b32.xlu0 %v1207_v53, %s1242_s1 }
 0x5ee   :  { %v1209_v55 = vpop.eup %1208 }
 0x5ef   :  { %v370_v56 = vmul.f32 0.5, %v1209_v55 }
 0x5f1   :  { %v371_v57 = vadd.f32 0.5, %v370_v56 }
 0x5f3   :  { %v373_v60 = vmul.f32 %v371_v57, %v285_v40 }
 0x65f   :  { %v376_v58 = vpop.permute.xlu0 %375 }
 0x660   :  { %v378_v59 = vmul.f32 %v376_v58, %v371_v57 }
 0x662   :  { %380 = vrot.lane.b32.xlu1 %v378_v59, %s1247_s12 }
 0x6d4   :  { %v381_v61 = vpop.permute.xlu1 %380 }
 0x6d5   :  { %v383_v62 = vadd.f32 %v381_v61, %v373_v60 }
 0x6d7   :  { %1210 = vtanh.f32 %v383_v62 }
 0x6e1   :  { %v1211_v4 = vpop.eup %1210 }
 0x6e2   :  { %386 = vrot.lane.b32.xlu0 %v1211_v4, %s1242_s1 }
 0x754   :  { %v387_v5 = vpop.permute.xlu0 %386 }
 0x755   :  { %v389_v6 = vmul.f32 %v387_v5, %v371_v57  ;;  %v161_v5 = vadd.f32 %v1297_v3, %v1385_v10 }
 0x757   :  { %391 = vrot.lane.b32.xlu1 %v389_v6, %s1247_s12 }
 0x7c9   :  { %v392_v11 = vpop.permute.xlu1 %391 }
 0x7ca   :  { %1083 = vmatmul.mubr.msk.f32.vlgmr.msra.gmra.mrb[8].mxu0 %vm192_vm2, %v392_v11 }
 0x7cb   :  { %1166 = vmatpush3.bf16.msra.mxu0 %v1313_v19  ;;  %1104 = vmatprep.mubr.msk.f32.mxu0 %vm1244_vm1, %v1245_v18 }
 0x7cc   :  { %1167 = vmatprep.subr.bf16.mxu0 %v1243_v14 }
 0x7cf   :  { %1169 = vmatpush3.bf16.msra.mxu0 %v1320_v21 }
 0x7d0   :  { %1176 = vmatprep.subr.bf16.mxu0 %v1243_v14 }
 0x89d   :  { %v461_v13 = vpop.f32.mrb[8].mxu0 }
 0x89e   :  { %v465_v15 = vadd.f32 %v461_v13, %v146_v12  ;;  %v1084_v16 = vpop.f32.mrb[9].mxu0 }
 0x8a0   :  { %1212 = vtanh.f32 %v465_v15  ;;  %v466_v20 = vmul.f32 0.5, %v465_v15 }
 0x8a2   :  { %1214 = vtanh.f32 %v466_v20 }
 0x8aa   :  { %v1213_v17 = vpop.eup %1212 }
 0x8ab   :  { %473 = vrot.lane.b32.xlu0 %v1213_v17, %s1242_s1 }
 0x8ac   :  { %v1215_v22 = vpop.eup %1214 }
 0x8ad   :  { %v468_v23 = vmul.f32 0.5, %v1215_v22 }
 0x8af   :  { %v469_v24 = vadd.f32 0.5, %v468_v23 }
 0x8b1   :  { %v471_v27 = vmul.f32 %v469_v24, %v383_v62 }
 0x91d   :  { %v474_v25 = vpop.permute.xlu0 %473 }
 0x91e   :  { %v476_v26 = vmul.f32 %v474_v25, %v469_v24 }
 0x920   :  { %478 = vrot.lane.b32.xlu1 %v476_v26, %s1247_s12 }
 0x992   :  { %v479_v28 = vpop.permute.xlu1 %478 }
 0x993   :  { %v481_v29 = vadd.f32 %v479_v28, %v471_v27  ;;  %v166_v27 = vadd.f32 %v1383_v9, %v1297_v3  ;;  %v880_v3 = vld [vmem:[%s1463_s4] sm:$0xff]  ;;  %v881_v9 = vld [vmem:[%s1463_s4 + $0x8] sm:$0xff] }
 0x995   :  { %1216 = vtanh.f32 %v481_v29 }
 0x99f   :  { %v1217_v30 = vpop.eup %1216 }
 0x9a0   :  { %484 = vrot.lane.b32.xlu0 %v1217_v30, %s1242_s1 }
 0xa12   :  { %v485_v31 = vpop.permute.xlu0 %484 }
 0xa13   :  { %v487_v32 = vmul.f32 %v485_v31, %v469_v24 }
 0xa15   :  { %489 = vrot.lane.b32.xlu1 %v487_v32, %s1247_s12 }
 0xa87   :  { %v490_v33 = vpop.permute.xlu1 %489 }
 0xa88   :  { %1094 = vmatmul.mubr.msk.f32.vlgmr.msra.gmra.mrb[4].mxu1 %vm192_vm2, %v490_v33 }
 0xa89   :  { %1172 = vmatpush3.bf16.msra.mxu1 %v1313_v19  ;;  %1115 = vmatprep.mubr.msk.f32.mxu1 %vm1244_vm1, %v1245_v18 }
 0xa8a   :  { %1173 = vmatprep.subr.bf16.mxu1 %v1243_v14 }
 0xa8d   :  { %1175 = vmatpush3.bf16.msra.mxu1 %v1320_v21 }
 0xa8e   :  { %1182 = vmatprep.subr.bf16.mxu1 %v1243_v14 }
 0xb5b   :  { %v559_v35 = vpop.f32.mrb[4].mxu1 }
 0xb5c   :  { %v563_v36 = vadd.f32 %v559_v35, %v151_v34  ;;  %v1095_v37 = vpop.f32.mrb[5].mxu1 }
 0xb5e   :  { %1218 = vtanh.f32 %v563_v36  ;;  %v564_v39 = vmul.f32 0.5, %v563_v36 }
 0xb60   :  { %1220 = vtanh.f32 %v564_v39 }
 0xb68   :  { %v1219_v38 = vpop.eup %1218 }
 0xb69   :  { %571 = vrot.lane.b32.xlu0 %v1219_v38, %s1242_s1 }
 0xb6a   :  { %v1221_v40 = vpop.eup %1220 }
 0xb6b   :  { %v566_v41 = vmul.f32 0.5, %v1221_v40 }
 0xb6d   :  { %v567_v42 = vadd.f32 0.5, %v566_v41  ;;  %v882_v41 = vld [vmem:[%s1463_s4 + $0x10] sm:$0xff] }
 0xb6f   :  { %v569_v45 = vmul.f32 %v567_v42, %v481_v29 }
 0xbdb   :  { %v572_v43 = vpop.permute.xlu0 %571 }
 0xbdc   :  { %v574_v44 = vmul.f32 %v572_v43, %v567_v42  ;;  %v883_v43 = vld [vmem:[%s1463_s4 + $0x18] sm:$0xff] }
 0xbde   :  { %576 = vrot.lane.b32.xlu1 %v574_v44, %s1247_s12  ;;  %v1186_v44 = vpack.c.bf16 %v883_v43, %v882_v41 }
 0xc50   :  { %v577_v46 = vpop.permute.xlu1 %576 }
 0xc51   :  { %v579_v47 = vadd.f32 %v577_v46, %v569_v45 }
 0xc53   :  { %1222 = vtanh.f32 %v579_v47 }
 0xc5d   :  { %v1223_v48 = vpop.eup %1222 }
 0xc5e   :  { %582 = vrot.lane.b32.xlu0 %v1223_v48, %s1242_s1 }
 0xcd0   :  { %v583_v49 = vpop.permute.xlu0 %582 }
 0xcd1   :  { %v585_v50 = vmul.f32 %v583_v49, %v567_v42  ;;  %v1183_v42 = vpack.c.bf16 %v881_v9, %v880_v3  ;;  %v987_v49 = vld [vmem:[%s1464_s5] ss:$0 sm:$0xff] }
 0xcd3   :  { %587 = vrot.lane.b32.xlu1 %v585_v50, %s1247_s12 }
 0xd45   :  { %v588_v51 = vpop.permute.xlu1 %587 }
 0xd46   :  { %1105 = vmatmul.mubr.msk.f32.vlgmr.msra.gmra.mrb[10].mxu0 %vm192_vm2, %v588_v51 }
 0xd47   :  { %1178 = vmatpush3.bf16.msra.mxu0 %v1313_v19  ;;  %1126 = vmatprep.mubr.msk.f32.mxu0 %vm1244_vm1, %v1245_v18 }
 0xd48   :  { %1179 = vmatprep.subr.bf16.mxu0 %v1243_v14 }
 0xd4b   :  { %1181 = vmatpush3.bf16.msra.mxu0 %v1320_v21 }
 0xe19   :  { %v657_v53 = vpop.f32.mrb[10].mxu0 }
 0xe1a   :  { %v661_v54 = vadd.f32 %v657_v53, %v156_v52  ;;  %v1106_v55 = vpop.f32.mrb[11].mxu0 }
 0xe1c   :  { %1224 = vtanh.f32 %v661_v54  ;;  %v662_v57 = vmul.f32 0.5, %v661_v54 }
 0xe1e   :  { %1226 = vtanh.f32 %v662_v57 }
 0xe26   :  { %v1225_v56 = vpop.eup %1224 }
 0xe27   :  { %669 = vrot.lane.b32.xlu0 %v1225_v56, %s1242_s1 }
 0xe28   :  { %v1227_v19 = vpop.eup %1226 }
 0xe29   :  { %v664_v58 = vmul.f32 0.5, %v1227_v19 }
 0xe2b   :  { %v665_v59 = vadd.f32 0.5, %v664_v58 }
 0xe2d   :  { %v667_v21 = vmul.f32 %v665_v59, %v579_v47 }
 0xe99   :  { %v670_v60 = vpop.permute.xlu0 %669 }
 0xe9a   :  { %v672_v61 = vmul.f32 %v670_v60, %v665_v59 }
 0xe9c   :  { %674 = vrot.lane.b32.xlu1 %v672_v61, %s1247_s12 }
 0xf0e   :  { %v675_v62 = vpop.permute.xlu1 %674 }
 0xf0f   :  { %v677_v63 = vadd.f32 %v675_v62, %v667_v21 }
 0xf11   :  { %1228 = vtanh.f32 %v677_v63 }
 0xf1b   :  { %v1229_v0 = vpop.eup %1228 }
 0xf1c   :  { %680 = vrot.lane.b32.xlu0 %v1229_v0, %s1242_s1 }
 0xf8e   :  { %v681_v1 = vpop.permute.xlu0 %680 }
 0xf8f   :  { %v683_v2 = vmul.f32 %v681_v1, %v665_v59 }
 0xf91   :  { %685 = vrot.lane.b32.xlu1 %v683_v2, %s1247_s12 }
0x1003   :  { %v686_v4 = vpop.permute.xlu1 %685 }
0x1004   :  { %1116 = vmatmul.mubr.msk.f32.vlgmr.msra.gmra.mrb[6].mxu1 %vm192_vm2, %v686_v4 }
0x1005   :  { %1137 = vmatprep.mubr.msk.f32.mxu1 %vm1244_vm1, %v1245_v18  ;;  %1184 = vmatpush3.bf16.msra.mxu1 %v1183_v42 }
0x1006   :  { %1185 = vmatprep.subr.bf16.mxu1 %v1243_v14 }
0x1009   :  { %1187 = vmatpush3.bf16.msra.mxu1 %v1186_v44 }
0x10d7   :  { %v755_v6 = vpop.f32.mrb[6].mxu1 }
0x10d8   :  { %v759_v7 = vadd.f32 %v755_v6, %v161_v5  ;;  %v1117_v8 = vpop.f32.mrb[7].mxu1 }
0x10da   :  { %1230 = vtanh.f32 %v759_v7  ;;  %v760_v12 = vmul.f32 0.5, %v759_v7 }
0x10dc   :  { %1232 = vtanh.f32 %v760_v12 }
0x10e4   :  { %v1231_v11 = vpop.eup %1230 }
0x10e5   :  { %767 = vrot.lane.b32.xlu0 %v1231_v11, %s1242_s1 }
0x10e6   :  { %v1233_v13 = vpop.eup %1232 }
0x10e7   :  { %v762_v15 = vmul.f32 0.5, %v1233_v13 }
0x10e9   :  { %v763_v16 = vadd.f32 0.5, %v762_v15 }
0x10eb   :  { %v765_v18 = vmul.f32 %v763_v16, %v677_v63 }
0x1157   :  { %v768_v17 = vpop.permute.xlu0 %767 }
0x1158   :  { %v770_v20 = vmul.f32 %v768_v17, %v763_v16 }
0x115a   :  { %772 = vrot.lane.b32.xlu1 %v770_v20, %s1247_s12 }
0x11cc   :  { %v773_v22 = vpop.permute.xlu1 %772 }
0x11cd   :  { %v775_v23 = vadd.f32 %v773_v22, %v765_v18 }
0x11cf   :  { %1234 = vtanh.f32 %v775_v23 }
0x11d9   :  { %v1235_v10 = vpop.eup %1234 }
0x11da   :  { %778 = vrot.lane.b32.xlu0 %v1235_v10, %s1242_s1 }
0x124c   :  { %v779_v24 = vpop.permute.xlu0 %778 }
0x124d   :  { %v781_v25 = vmul.f32 %v779_v24, %v763_v16 }
0x124f   :  { %783 = vrot.lane.b32.xlu1 %v781_v25, %s1247_s12 }
0x12c1   :  { %v784_v26 = vpop.permute.xlu1 %783 }
0x12c2   :  { %1127 = vmatmul.mubr.msk.f32.vlgmr.msra.gmra.mrb[12].mxu0 %vm192_vm2, %v784_v26 }
0x1395   :  { %v853_v28 = vpop.f32.mrb[12].mxu0 }
0x1396   :  { %v857_v29 = vadd.f32 %v853_v28, %v166_v27  ;;  %v1128_v30 = vpop.f32.mrb[13].mxu0 }
0x1398   :  { %1236 = vtanh.f32 %v857_v29  ;;  %v858_v32 = vmul.f32 0.5, %v857_v29 }
0x139a   :  { %1238 = vtanh.f32 %v858_v32 }
0x13a2   :  { %v1237_v31 = vpop.eup %1236 }
0x13a3   :  { %865 = vrot.lane.b32.xlu0 %v1237_v31, %s1242_s1 }
0x13a4   :  { %v1239_v33 = vpop.eup %1238 }
0x13a5   :  { %v860_v34 = vmul.f32 0.5, %v1239_v33 }
0x13a7   :  { %v861_v35 = vadd.f32 0.5, %v860_v34 }
0x13a9   :  { %v863_v38 = vmul.f32 %v861_v35, %v775_v23 }
0x1415   :  { %v866_v36 = vpop.permute.xlu0 %865 }
0x1416   :  { %v868_v37 = vmul.f32 %v866_v36, %v861_v35 }
0x1418   :  { %870 = vrot.lane.b32.xlu1 %v868_v37, %s1247_s12 }
0x148a   :  { %v871_v39 = vpop.permute.xlu1 %870 }
0x148b   :  { %v873_v40 = vadd.f32 %v871_v39, %v863_v38 }
0x148d   :  { %1240 = vtanh.f32 %v873_v40 }
0x1497   :  { %v1241_v45 = vpop.eup %1240 }
0x1498   :  { %876 = vrot.lane.b32.xlu0 %v1241_v45, %s1242_s1 }
0x150a   :  { %v877_v46 = vpop.permute.xlu0 %876 }
0x150b   :  { %v879_v47 = vmul.f32 %v877_v46, %v861_v35 }
0x150d   :  { %892 = vrot.lane.b32.xlu1 %v879_v47, %s1247_s12 }
0x157f   :  { %v893_v48 = vpop.permute.xlu1 %892 }
0x1580   :  { %1138 = vmatmul.mubr.msk.f32.vlgmr.msra.gmra.mrb[8].mxu1 %vm192_vm2, %v893_v48 }
0x1653   :  { %v962_v50 = vpop.f32.mrb[8].mxu1 }
0x1654   :  { %v963_v51 = vadd.f32 %v987_v49, %v962_v50  ;;  %v1139_v52 = vpop.f32.mrb[9].mxu1 }
0x1656   :  { %966 = vst [vmem:[%s1465_s6] sm:$0xff] %v963_v51 }

</bundles_post_ra>
